<compile_context>
chip_gen: v7x
topology: tpu7x:2x2x1
jax: 0.10.0
libtpu: 0.0.40
codegen_flags: <defaults>
</compile_context>

<pallas_src>
import functools
import math

import jax
import jax.numpy as jnp
from jax.experimental import pallas as pl
from jax.experimental.pallas import tpu as pltpu


def _pos_inject_kernel(h, x_ref, w_ref, b_ref, o_ref):
    """One block = several whole h x h images flattened to (tokens, C_tile).

    x_ref : (n_tok, C_tile)  tokens (native dtype), n_tok = tb * h * h
    w_ref : (9, C_tile)      f32 depthwise taps, k = ki*3 + kj; w[4] has the
                             residual (+1) folded in.
    b_ref : (1, C_tile)      f32 bias
    o_ref : (n_tok, C_tile)
    """
    x = x_ref[...]                     # native dtype; no full-tile f32 upcast
    w = w_ref[...]                     # (9, C_tile) f32
    b = b_ref[...]                     # (1, C_tile) f32
    n_tok = x.shape[0]
    n_img = h * h

    # Per-token position inside its image, from the in-block token index
    # (blocks always hold whole images, so in-block index mod N is exact).
    p = jax.lax.broadcasted_iota(jnp.int32, (n_tok, 1), 0)
    col = p % h                        # column j within the image row
    t_img = p % n_img                  # token index within the image

    # Left/right neighbours: XLU sublane roll along the flattened token axis.
    # The edge masks also kill the roll's wrap-around across image/block
    # boundaries, so no halo data is ever needed.
    x_l = jnp.where(col > 0, pltpu.roll(x, 1, axis=0), 0)              # x(i, j-1)
    x_r = jnp.where(col < h - 1, pltpu.roll(x, n_tok - 1, axis=0), 0)  # x(i, j+1)

    def hcombo(ki):
        # Sum over kernel columns for kernel row `ki`; f32 accumulation,
        # operands stay narrow until the MAC (w rows are f32 -> f32 products).
        return (x_l * w[3 * ki + 0:3 * ki + 1, :]
                + x * w[3 * ki + 1:3 * ki + 2, :]
                + x_r * w[3 * ki + 2:3 * ki + 3, :])

    acc = hcombo(1) + b                                      # centre row (+ residual) + bias
    top = pltpu.roll(hcombo(0), h, axis=0)                   # contribution coming from row i-1
    bot = pltpu.roll(hcombo(2), n_tok - h, axis=0)           # contribution coming from row i+1
    acc = acc + jnp.where(t_img >= h, top, 0.0)              # row 0 has no row above
    acc = acc + jnp.where(t_img < n_img - h, bot, 0.0)       # last row has no row below

    o_ref[...] = acc.astype(o_ref.dtype)


def pos_inject_layer(x, w_dw, bias):
    """PosInjectLayer forward.

    x    : (B, N, C) with N = h*h (token-major, channels-last)
    w_dw : (C, 3, 3)  depthwise conv weights (PyTorch peg.weight[:, 0, :, :])
    bias : (C,)       peg.bias
    returns (B, N, C)
    """
    B, N, C = x.shape
    h = int(math.isqrt(N))
    assert h * h == N, "num_tokens must be a perfect square"
    # TODO(synk): stride != 1 not implemented (the residual add in the original
    # module is only shape-consistent for stride == 1 anyway).

    itemsize = jnp.dtype(x.dtype).itemsize

    # Channel tile: full C, or lane-dense 128-wide slabs when C is wide.
    tc = 128 if (C % 128 == 0 and C > 128) else C

    # Images per grid step: aim for ~1 MiB of input per step (>=2 MiB moved
    # incl. output) and keep the block token-dim a multiple of 8.
    per_img = N * tc * itemsize
    need = 8 // math.gcd(N, 8)                       # images for sublane alignment
    tb = max(need, min(B, (1 << 20) // max(per_img, 1)))
    tb -= tb % need
    nb = -(-B // tb)                                 # number of image blocks
    b_pad = nb * tb

    tokens = x.reshape(B * N, C)                     # free: contiguous metadata reshape
    if b_pad != B:
        # Rare path (N not a multiple of 8 and small B): pad with zero images.
        tokens = jnp.concatenate(
            [tokens, jnp.zeros(((b_pad - B) * N, C), x.dtype)], axis=0)

    # Depthwise taps with channels on the lane axis, kept in f32.  Fold the
    # residual (+x) exactly into the centre tap so the kernel adds it for free.
    w_taps = jnp.transpose(w_dw, (1, 2, 0)).reshape(9, C).astype(jnp.float32)
    w_taps = w_taps.at[4].add(1.0)
    b2 = bias.reshape(1, C).astype(jnp.float32)

    tbn = tb * N
    grid = (b_pad * N // tbn, C // tc)

    flops = B * N * C * (2 * 9 + 6)                  # 9 MACs + bias/residual/mask work
    bytes_accessed = 2 * B * N * C * itemsize + (w_taps.size + b2.size) * 4

    out = pl.pallas_call(
        functools.partial(_pos_inject_kernel, h),
        out_shape=jax.ShapeDtypeStruct((b_pad * N, C), x.dtype),
        grid_spec=pltpu.PrefetchScalarGridSpec(
            num_scalar_prefetch=0,
            grid=grid,
            in_specs=[
                pl.BlockSpec((tbn, tc), lambda g, c: (g, c)),
                pl.BlockSpec((9, tc), lambda g, c: (0, c)),
                pl.BlockSpec((1, tc), lambda g, c: (0, c)),
            ],
            out_specs=pl.BlockSpec((tbn, tc), lambda g, c: (g, c)),
        ),
        compiler_params=pltpu.CompilerParams(
            dimension_semantics=("parallel", "parallel"),
            vmem_limit_bytes=32 * 1024 * 1024),
        cost_estimate=pl.CostEstimate(
            flops=flops, transcendentals=0, bytes_accessed=bytes_accessed),
    )(tokens, w_taps, b2)

    if b_pad != B:
        out = out[: B * N]
    return out.reshape(B, N, C)


def init_params(key, dim, dtype=jnp.float32):
    """Deterministic init mimicking nn.Conv2d default (uniform +-1/sqrt(9))."""
    kw, kb = jax.random.split(key)
    lim = 1.0 / math.sqrt(9.0)
    w_dw = jax.random.uniform(kw, (dim, 3, 3), dtype, -lim, lim)
    bias = jax.random.uniform(kb, (dim,), dtype, -lim, lim)
    return w_dw, bias


def _reference(x, w_dw, bias):
    """Plain-JAX reference (matches the PyTorch module for stride=1)."""
    B, N, C = x.shape
    h = int(math.isqrt(N))
    img = x.reshape(B, h, h, C)
    kern = jnp.transpose(w_dw, (1, 2, 0))[:, :, None, :]     # (3,3,1,C) HWIO
    conv = jax.lax.conv_general_dilated(
        img, kern, window_strides=(1, 1), padding=((1, 1), (1, 1)),
        dimension_numbers=("NHWC", "HWIO", "NHWC"),
        feature_group_count=C)
    out = conv + bias[None, None, None, :] + img
    return out.reshape(B, N, C)


if __name__ == "__main__":
    B, h, C = 2, 8, 128          # num_tokens = 64; C lane-dense (multiple of 128)
    N = h * h

    key = jax.random.PRNGKey(0)
    kx, kp = jax.random.split(key)
    x = jax.random.normal(kx, (B, N, C), jnp.float32)
    w_dw, bias = init_params(kp, C)

    out = pos_inject_layer(x, w_dw, bias)
    out = jax.block_until_ready(out)

    ref = _reference(x, w_dw, bias)
    assert out.shape == (B, N, C)
    assert jnp.allclose(out, ref, atol=1e-4, rtol=1e-4), float(jnp.max(jnp.abs(out - ref)))

    print("KERNEL_OK")
</pallas_src>

<mosaic_0001>
module attributes {stable_mosaic.version = 11 : i64} {
  func.func @_pos_inject_kernel(%arg0: i32, %arg1: i32, %arg2: memref<128x128xf32, #tpu.memory_space<vmem>>, %arg3: memref<9x128xf32, #tpu.memory_space<vmem>>, %arg4: memref<1x128xf32, #tpu.memory_space<vmem>>, %arg5: memref<128x128xf32, #tpu.memory_space<vmem>>) attributes {dimension_semantics = [#tpu.dimension_semantics<parallel>, #tpu.dimension_semantics<parallel>], iteration_bounds = array<i64: 1, 1>, scalar_prefetch = 0 : i64, scratch_operands = 0 : i64, tpu.core_type = #tpu.core_type<tc>, window_params = [{transform_indices = @transform_0, window_bounds = array<i64: 128, 128>}, {transform_indices = @transform_1, window_bounds = array<i64: 9, 128>}, {transform_indices = @transform_2, window_bounds = array<i64: 1, 128>}, {transform_indices = @transform_3, window_bounds = array<i64: 128, 128>}]} {
    %c0 = arith.constant 0 : index
    %c0_0 = arith.constant 0 : index
    %0 = vector.load %arg2[%c0, %c0_0] : memref<128x128xf32, #tpu.memory_space<vmem>>, vector<128x128xf32>
    %c0_1 = arith.constant 0 : index
    %c0_2 = arith.constant 0 : index
    %1 = vector.load %arg3[%c0_1, %c0_2] : memref<9x128xf32, #tpu.memory_space<vmem>>, vector<9x128xf32>
    %c0_3 = arith.constant 0 : index
    %c0_4 = arith.constant 0 : index
    %2 = vector.load %arg4[%c0_3, %c0_4] : memref<1x128xf32, #tpu.memory_space<vmem>>, vector<1x128xf32>
    %3 = tpu.iota {dimensions = array<i32: 0>} : vector<128x1xi32>
    %c8_i32 = arith.constant 8 : i32
    %c0_i32 = arith.constant 0 : i32
    %4 = arith.cmpi eq, %c8_i32, %c0_i32 : i32
    %c1_i32 = arith.constant 1 : i32
    %5 = arith.select %4, %c1_i32, %c8_i32 : i32
    %6 = vector.broadcast %5 : i32 to vector<128x1xi32>
    %7 = arith.remsi %3, %6 : vector<128x1xi32>
    %c0_i32_5 = arith.constant 0 : i32
    %8 = vector.broadcast %c0_i32_5 : i32 to vector<128x1xi32>
    %9 = arith.cmpi ne, %7, %8 : vector<128x1xi32>
    %c0_i32_6 = arith.constant 0 : i32
    %10 = vector.broadcast %c0_i32_6 : i32 to vector<128x1xi32>
    %11 = arith.cmpi slt, %7, %10 : vector<128x1xi32>
    %c0_i32_7 = arith.constant 0 : i32
    %12 = arith.cmpi slt, %5, %c0_i32_7 : i32
    %13 = vector.broadcast %12 : i1 to vector<128x1xi1>
    %14 = vector.broadcast %13 : vector<128x1xi1> to vector<128x1xi1>
    %15 = arith.xori %11, %14 : vector<128x1xi1>
    %16 = arith.andi %15, %9 : vector<128x1xi1>
    %17 = vector.broadcast %5 : i32 to vector<128x1xi32>
    %18 = arith.addi %7, %17 : vector<128x1xi32>
    %19 = arith.select %16, %18, %7 : vector<128x1xi1>, vector<128x1xi32>
    %c64_i32 = arith.constant 64 : i32
    %c0_i32_8 = arith.constant 0 : i32
    %20 = arith.cmpi eq, %c64_i32, %c0_i32_8 : i32
    %c1_i32_9 = arith.constant 1 : i32
    %21 = arith.select %20, %c1_i32_9, %c64_i32 : i32
    %22 = vector.broadcast %21 : i32 to vector<128x1xi32>
    %23 = arith.remsi %3, %22 : vector<128x1xi32>
    %c0_i32_10 = arith.constant 0 : i32
    %24 = vector.broadcast %c0_i32_10 : i32 to vector<128x1xi32>
    %25 = arith.cmpi ne, %23, %24 : vector<128x1xi32>
    %c0_i32_11 = arith.constant 0 : i32
    %26 = vector.broadcast %c0_i32_11 : i32 to vector<128x1xi32>
    %27 = arith.cmpi slt, %23, %26 : vector<128x1xi32>
    %c0_i32_12 = arith.constant 0 : i32
    %28 = arith.cmpi slt, %21, %c0_i32_12 : i32
    %29 = vector.broadcast %28 : i1 to vector<128x1xi1>
    %30 = vector.broadcast %29 : vector<128x1xi1> to vector<128x1xi1>
    %31 = arith.xori %27, %30 : vector<128x1xi1>
    %32 = arith.andi %31, %25 : vector<128x1xi1>
    %33 = vector.broadcast %21 : i32 to vector<128x1xi32>
    %34 = arith.addi %23, %33 : vector<128x1xi32>
    %35 = arith.select %32, %34, %23 : vector<128x1xi1>, vector<128x1xi32>
    %c0_i32_13 = arith.constant 0 : i32
    %36 = vector.broadcast %c0_i32_13 : i32 to vector<128x1xi32>
    %37 = arith.cmpi sgt, %19, %36 : vector<128x1xi32>
    %c1_i32_14 = arith.constant 1 : i32
    %38 = tpu.dynamic_rotate %0 by %c1_i32_14 dim 0 : vector<128x128xf32>, i32 -> vector<128x128xf32>
    %c0_i32_15 = arith.constant 0 : i32
    %39 = arith.sitofp %c0_i32_15 : i32 to f32
    %40 = vector.shape_cast %37 : vector<128x1xi1> to vector<128x1xi1>
    %41 = vector.broadcast %40 : vector<128x1xi1> to vector<128x128xi1>
    %42 = vector.broadcast %39 : f32 to vector<128x128xf32>
    %43 = arith.select %41, %38, %42 : vector<128x128xi1>, vector<128x128xf32>
    %c7_i32 = arith.constant 7 : i32
    %44 = vector.broadcast %c7_i32 : i32 to vector<128x1xi32>
    %45 = arith.cmpi slt, %19, %44 : vector<128x1xi32>
    %c127_i32 = arith.constant 127 : i32
    %46 = tpu.dynamic_rotate %0 by %c127_i32 dim 0 : vector<128x128xf32>, i32 -> vector<128x128xf32>
    %c0_i32_16 = arith.constant 0 : i32
    %47 = arith.sitofp %c0_i32_16 : i32 to f32
    %48 = vector.shape_cast %45 : vector<128x1xi1> to vector<128x1xi1>
    %49 = vector.broadcast %48 : vector<128x1xi1> to vector<128x128xi1>
    %50 = vector.broadcast %47 : f32 to vector<128x128xf32>
    %51 = arith.select %49, %46, %50 : vector<128x128xi1>, vector<128x128xf32>
    %52 = vector.extract_strided_slice %1 {offsets = [3, 0], sizes = [1, 128], strides = [1, 1]} : vector<9x128xf32> to vector<1x128xf32>
    %53 = vector.broadcast %52 : vector<1x128xf32> to vector<128x128xf32>
    %54 = arith.mulf %43, %53 : vector<128x128xf32>
    %55 = vector.extract_strided_slice %1 {offsets = [4, 0], sizes = [1, 128], strides = [1, 1]} : vector<9x128xf32> to vector<1x128xf32>
    %56 = vector.broadcast %55 : vector<1x128xf32> to vector<128x128xf32>
    %57 = arith.mulf %0, %56 : vector<128x128xf32>
    %58 = arith.addf %54, %57 : vector<128x128xf32>
    %59 = vector.extract_strided_slice %1 {offsets = [5, 0], sizes = [1, 128], strides = [1, 1]} : vector<9x128xf32> to vector<1x128xf32>
    %60 = vector.broadcast %59 : vector<1x128xf32> to vector<128x128xf32>
    %61 = arith.mulf %51, %60 : vector<128x128xf32>
    %62 = arith.addf %58, %61 : vector<128x128xf32>
    %63 = vector.broadcast %2 : vector<1x128xf32> to vector<128x128xf32>
    %64 = arith.addf %62, %63 : vector<128x128xf32>
    %65 = vector.extract_strided_slice %1 {offsets = [0, 0], sizes = [1, 128], strides = [1, 1]} : vector<9x128xf32> to vector<1x128xf32>
    %66 = vector.broadcast %65 : vector<1x128xf32> to vector<128x128xf32>
    %67 = arith.mulf %43, %66 : vector<128x128xf32>
    %68 = vector.extract_strided_slice %1 {offsets = [1, 0], sizes = [1, 128], strides = [1, 1]} : vector<9x128xf32> to vector<1x128xf32>
    %69 = vector.broadcast %68 : vector<1x128xf32> to vector<128x128xf32>
    %70 = arith.mulf %0, %69 : vector<128x128xf32>
    %71 = arith.addf %67, %70 : vector<128x128xf32>
    %72 = vector.extract_strided_slice %1 {offsets = [2, 0], sizes = [1, 128], strides = [1, 1]} : vector<9x128xf32> to vector<1x128xf32>
    %73 = vector.broadcast %72 : vector<1x128xf32> to vector<128x128xf32>
    %74 = arith.mulf %51, %73 : vector<128x128xf32>
    %75 = arith.addf %71, %74 : vector<128x128xf32>
    %c8_i32_17 = arith.constant 8 : i32
    %76 = tpu.dynamic_rotate %75 by %c8_i32_17 dim 0 : vector<128x128xf32>, i32 -> vector<128x128xf32>
    %77 = vector.extract_strided_slice %1 {offsets = [6, 0], sizes = [1, 128], strides = [1, 1]} : vector<9x128xf32> to vector<1x128xf32>
    %78 = vector.broadcast %77 : vector<1x128xf32> to vector<128x128xf32>
    %79 = arith.mulf %43, %78 : vector<128x128xf32>
    %80 = vector.extract_strided_slice %1 {offsets = [7, 0], sizes = [1, 128], strides = [1, 1]} : vector<9x128xf32> to vector<1x128xf32>
    %81 = vector.broadcast %80 : vector<1x128xf32> to vector<128x128xf32>
    %82 = arith.mulf %0, %81 : vector<128x128xf32>
    %83 = arith.addf %79, %82 : vector<128x128xf32>
    %84 = vector.extract_strided_slice %1 {offsets = [8, 0], sizes = [1, 128], strides = [1, 1]} : vector<9x128xf32> to vector<1x128xf32>
    %85 = vector.broadcast %84 : vector<1x128xf32> to vector<128x128xf32>
    %86 = arith.mulf %51, %85 : vector<128x128xf32>
    %87 = arith.addf %83, %86 : vector<128x128xf32>
    %c120_i32 = arith.constant 120 : i32
    %88 = tpu.dynamic_rotate %87 by %c120_i32 dim 0 : vector<128x128xf32>, i32 -> vector<128x128xf32>
    %c8_i32_18 = arith.constant 8 : i32
    %89 = vector.broadcast %c8_i32_18 : i32 to vector<128x1xi32>
    %90 = arith.cmpi sge, %35, %89 : vector<128x1xi32>
    %cst = arith.constant 0.000000e+00 : f32
    %91 = vector.shape_cast %90 : vector<128x1xi1> to vector<128x1xi1>
    %92 = vector.broadcast %91 : vector<128x1xi1> to vector<128x128xi1>
    %93 = vector.broadcast %cst : f32 to vector<128x128xf32>
    %94 = arith.select %92, %76, %93 : vector<128x128xi1>, vector<128x128xf32>
    %95 = arith.addf %64, %94 : vector<128x128xf32>
    %c56_i32 = arith.constant 56 : i32
    %96 = vector.broadcast %c56_i32 : i32 to vector<128x1xi32>
    %97 = arith.cmpi slt, %35, %96 : vector<128x1xi32>
    %cst_19 = arith.constant 0.000000e+00 : f32
    %98 = vector.shape_cast %97 : vector<128x1xi1> to vector<128x1xi1>
    %99 = vector.broadcast %98 : vector<128x1xi1> to vector<128x128xi1>
    %100 = vector.broadcast %cst_19 : f32 to vector<128x128xf32>
    %101 = arith.select %99, %88, %100 : vector<128x128xi1>, vector<128x128xf32>
    %102 = arith.addf %95, %101 : vector<128x128xf32>
    %c0_20 = arith.constant 0 : index
    %c0_21 = arith.constant 0 : index
    %103 = vector.load %arg5[%c0_20, %c0_21] : memref<128x128xf32, #tpu.memory_space<vmem>>, vector<128x128xf32>
    tpu.vector_store %arg5[%c0_20, %c0_21], %102 {strides = array<i32>} : memref<128x128xf32, #tpu.memory_space<vmem>>, vector<128x128xf32>,
    return
  }
  func.func @transform_0(%arg0: i32, %arg1: i32) -> (i32, i32) {
    %c0_i32 = arith.constant 0 : i32
    return %arg0, %arg1 : i32, i32
  }
  func.func @transform_1(%arg0: i32, %arg1: i32) -> (i32, i32) {
    %c0_i32 = arith.constant 0 : i32
    %c0_i32_0 = arith.constant 0 : i32
    return %c0_i32, %arg1 : i32, i32
  }
  func.func @transform_2(%arg0: i32, %arg1: i32) -> (i32, i32) {
    %c0_i32 = arith.constant 0 : i32
    %c0_i32_0 = arith.constant 0 : i32
    return %c0_i32, %arg1 : i32, i32
  }
  func.func @transform_3(%arg0: i32, %arg1: i32) -> (i32, i32) {
    %c0_i32 = arith.constant 0 : i32
    return %arg0, %arg1 : i32, i32
  }
}

</mosaic_0001>

<bundles_post_ra>
// kernel: tpu_custom_call.1
= control target key start
LH: loop header
LB: loop body
LE: loop exit
PB: predicated region body
PF: predicated region fallthrough
CT: control target
= control target key end

     0   :  { %8 = vsyncpa [#allocation3], 0  ;;  %s1786_s0 = inlined_call_operand.hbm [shape: f32[128,128], index: 0, kind: input, shape index: {}]   ;;  %s1787_s1 = inlined_call_operand.hbm [shape: f32[9,128], index: 1, kind: input, shape index: {}]   ;;  %s1788_s2 = inlined_call_operand.vmem [shape: f32[1,128], index: 2, kind: input, shape index: {}]   ;;  %s1789_s3 = inlined_call_operand.hbm [shape: f32[128,128], index: 3, kind: output, shape index: {}]  }
   0x1   :  { %9 = vsyncpa [#allocation6], 0 }
   0x2   :  { %10 = vsyncpa [#allocation4], 0  ;;  %s1228_s12 = smov [#allocation2]   ;;  %s1156_s16 = scalar_lea.hbm %s1786_s0, 2048 }
   0x3   :  { %s16_s13 = sshll.u32 %s1228_s12, 4  ;;  %p1157_p0 = scmp.ne.s32.totalorder %s1786_s0, %s1156_s16  ;;  %s17_s13 = int_to_ptr.vmem [resolvable:$true] %s16_s13 }
   0x4   :  { %p1160_p1 = scmp.lt.u32.totalorder %s1156_s16, %s1786_s0 }
   0x6   :  { %p1162_p2 = pnand %p1160_p1, %p1157_p0 }
   0x8   :  { %1165 = shalt.err (!%p1162_p2)
}
   0x9   :  { %s1166_s21 = scalar_lea.vmem %s17_s13, 2048  ;;  %p1171_p4 = scmp.lt.s32.totalorder %s17_s13, %s17_s13 }
   0xa   :  { %p1167_p3 = scmp.ne.s32.totalorder %s17_s13, %s1166_s21  ;;  %p1172_p5 = scmp.lt.s32.totalorder %s1166_s21, %s1166_s21 }
   0xc   :  { %p1173_p6 = por %p1172_p5, %p1171_p4 }
   0xe   :  { %p1174_p7 = pnand %p1173_p6, %p1167_p3 }
  0x10   :  { %1177 = shalt.err (!%p1174_p7)
}
  0x11   :  { %s1229_s22 = smov 128   ;;  %s1230_s23 = smov 8  }
  0x12   :  { %22 = dma.hbm_to_vmem [thread:$0]  %s1786_s0, 2048, %s17_s13, [#allocation3], %s1229_s22, %s1229_s22, %s1230_s23  }
  0x13   :  { %s1231_s26 = smov [#allocation5]   ;;  %s1178_s30 = scalar_lea.hbm %s1787_s1, 256 }
  0x14   :  { %s28_s27 = sshll.u32 %s1231_s26, 4  ;;  %p1179_p8 = scmp.ne.s32.totalorder %s1787_s1, %s1178_s30  ;;  %s29_s27 = int_to_ptr.vmem [resolvable:$true] %s28_s27 }
  0x15   :  { %p1182_p9 = scmp.lt.u32.totalorder %s1178_s30, %s1787_s1 }
  0x17   :  { %p1184_p10 = pnand %p1182_p9, %p1179_p8 }
  0x19   :  { %1187 = shalt.err (!%p1184_p10)
}
  0x1a   :  { %s1188_s8 = scalar_lea.vmem %s29_s27, 256  ;;  %p1193_p12 = scmp.lt.s32.totalorder %s29_s27, %s29_s27 }
  0x1b   :  { %p1189_p11 = scmp.ne.s32.totalorder %s29_s27, %s1188_s8  ;;  %p1194_p13 = scmp.lt.s32.totalorder %s1188_s8, %s1188_s8 }
  0x1d   :  { %p1195_p0 = por %p1194_p13, %p1193_p12 }
  0x1f   :  { %p1196_p1 = pnand %p1195_p0, %p1189_p11 }
  0x21   :  { %1199 = shalt.err (!%p1196_p1)
}
  0x22   :  { %34 = dma.hbm_to_vmem [thread:$0]  %s1787_s1, 256, %s29_s27, [#allocation6], %s1229_s22, %s1229_s22, %s1230_s23  }
  0x23   :  { %1222 = dma.done.wait [#allocation3], 2048  }
  0x24   :  { %1223 = vsyncadd [#allocation3], 4294965248 }
  0x25   :  { %1224 = dma.done.wait [#allocation6], 256  }
  0x26   :  { %1225 = vsyncadd [#allocation6], 4294967040  ;;  %v62_v0 = vlaneseq  ;;  %v1293_v9 = vld [vmem:[#allocation2] sm:$0xff]  ;;  %v1295_v10 = vld [vmem:[#allocation2 + $0x8] sm:$0xff] }
  0x27   :  { %v1307_v15 = vld [vmem:[#allocation2 + $0x78] sm:$0xff]  ;;  %v1309_v16 = vld [vmem:[#allocation5] sm:$0xff]  ;;  %v479_v18 = vrot.slane %v1293_v9, 7  ;;  %v1318_v21 = vld [vmem:[#allocation2 + $0x10] sm:$0xff]  ;;  %v480_v22 = vrot.slane %v1295_v10, 7  ;;  %v576_v25 = vrot.slane %v1293_v9, 1 }
  0x28   :  { %v1283_v1 = vshrl.u32 %v62_v0, 7  ;;  %v494_v23 = vrot.slane %v1307_v15, 7  ;;  %v577_v26 = vrot.slane %v1295_v10, 1  ;;  %v578_v27 = vrot.slane %v1318_v21, 1  ;;  %v1335_v30 = vld [vmem:[#allocation5 + $0x8] ss:$0 sm:$0xff] }
  0x29   :  { %v1378_v47 = vld [vmem:[#allocation2 + $0x18] sm:$0xff]  ;;  %v481_v50 = vrot.slane %v1318_v21, 7  ;;  %v1395_v58 = vld [vmem:[%s1788_s2] ss:$0 sm:$0xff]  ;;  %s1232_s2 = smov [#allocation7]  }
  0x2a   :  { %v64_v2 = vadd.s32 8, %v1283_v1  ;;  %v83_v3 = vand.u32 7, %v1283_v1  ;;  %vm495_vm0 = vcmp.lt.s32.totalorder %v1283_v1, 1  ;;  %vm592_vm1 = vcmp.lt.s32.totalorder %v1283_v1, 7  ;;  %s1136_s11 = sshll.u32 %s1232_s2, 4  ;;  %s1137_s11 = int_to_ptr.vmem [resolvable:$true] %s1136_s11 }
  0x2b   :  { %v659_v4 = vsub.s32 3, %v1283_v1  ;;  %v679_v6 = vsub.s32 4, %v1283_v1  ;;  %v715_v7 = vsub.s32 5, %v1283_v1  ;;  %v865_v8 = vsub.s32 6, %v1283_v1  ;;  %s1200_s12 = scalar_lea.vmem %s1137_s11, 2048  ;;  %p1205_p3 = scmp.lt.s32.totalorder %s1137_s11, %s1137_s11 }
  0x2c   :  { %v90_v5 = vand.u32 7, %v64_v2  ;;  %vm1297_vm2 = vcmp.gt.s32.totalorder %v83_v3, 0  ;;  %vm1301_vm3 = vcmp.lt.s32.totalorder %v83_v3, 7  ;;  %v885_v13 = vsub.s32 7, %v1283_v1  ;;  %p1201_p2 = scmp.ne.s32.totalorder %s1137_s11, %s1200_s12  ;;  %p1206_p4 = scmp.lt.s32.totalorder %s1200_s12, %s1200_s12 }
  0x2d   :  { %v65_v14 = vadd.s32 16, %v1283_v1  ;;  %v773_v19 = vsub.s32 0, %v1283_v1  ;;  %v793_v20 = vsub.s32 1, %v1283_v1  ;;  %v1330_v28 = vrot.slane %v1309_v16, %v659_v4 }
  0x2e   :  { %vm1311_vm4 = vcmp.gt.s32.totalorder %v90_v5, 0  ;;  %vm1322_vm5 = vcmp.lt.s32.totalorder %v90_v5, 7  ;;  %v1333_v29 = vrot.slane %v1309_v16, %v679_v6  ;;  %v510_v31 = vsel %vm495_vm0, %v479_v18, %v480_v22  ;;  %p1207_p5 = por %p1206_p4, %p1205_p3 }
  0x2f   :  { %v511_v32 = vsel %vm495_vm0, %v494_v23, %v479_v18  ;;  %v1344_v33 = vrot.slane %v1309_v16, %v715_v7  ;;  %v1347_v34 = vrot.slane %v1309_v16, %v865_v8  ;;  %v1353_v36 = vsel %vm1311_vm4, %v510_v31, 0.0 }
  0x30   :  { %v544_v35 = vsel %vm1297_vm2, %v511_v32, 0.0  ;;  %v606_v37 = vsel %vm592_vm1, %v577_v26, %v578_v27  ;;  %v607_v38 = vsel %vm592_vm1, %v576_v25, %v577_v26  ;;  %v681_v42 = vmul.f32 %v1333_v29, %v1293_v9  ;;  %p1208_p6 = pnand %p1207_p5, %p1201_p2 }
  0x31   :  { %v641_v39 = vsel %vm1301_vm3, %v607_v38, 0.0  ;;  %v1365_v40 = vsel %vm1322_vm5, %v606_v37, 0.0  ;;  %v661_v41 = vmul.f32 %v1330_v28, %v544_v35  ;;  %v868_v44 = vmul.f32 %v1347_v34, %v1353_v36 }
  0x32   :  { %v717_v43 = vmul.f32 %v1344_v33, %v641_v39  ;;  %v1374_v45 = vrot.slane %v1309_v16, %v885_v13  ;;  %v924_v46 = vmul.f32 %v1335_v30, %v1365_v40  ;;  %v97_v49 = vand.u32 7, %v65_v14 }
  0x33   :  { %v697_v48 = vadd.f32 %v681_v42, %v661_v41  ;;  %v579_v51 = vrot.slane %v1378_v47, 1  ;;  %v662_v53 = vmul.f32 %v1330_v28, %v1353_v36  ;;  %v682_v54 = vmul.f32 %v1333_v29, %v1295_v10 }
  0x34   :  { %v888_v52 = vmul.f32 %v1374_v45, %v1295_v10  ;;  %v718_v55 = vmul.f32 %v1344_v33, %v1365_v40  ;;  %vm465_vm6 = vcmp.gt.s32.totalorder %v97_v49, 0  ;;  %v509_v57 = vsel %vm495_vm0, %v480_v22, %v481_v50 }
  0x35   :  { %v733_v56 = vadd.f32 %v717_v43, %v697_v48  ;;  %vm562_vm7 = vcmp.lt.s32.totalorder %v97_v49, 7  ;;  %v1397_v60 = vsel %vm465_vm6, %v509_v57, 0.0  ;;  %v605_v61 = vsel %vm592_vm1, %v578_v27, %v579_v51  ;;  %v1456_v57 = vld [vmem:[#allocation2 + $0x28] sm:$0xff] }
  0x36   :  { %v904_v59 = vadd.f32 %v888_v52, %v868_v44  ;;  %v698_v62 = vadd.f32 %v682_v54, %v662_v53  ;;  %v1402_v0 = vsel %vm562_vm7, %v605_v61, 0.0  ;;  %v1405_v2 = vrot.slane %v1309_v16, %v773_v19  ;;  %v1424_v19 = vld [vmem:[#allocation2 + $0x20] sm:$0xff] }
  0x37   :  { %v755_v63 = vadd.f32 %v1395_v58, %v733_v56  ;;  %v1408_v3 = vrot.slane %v1309_v16, %v793_v20  ;;  %v829_v6 = vsub.s32 2, %v1283_v1  ;;  %v869_v7 = vmul.f32 %v1347_v34, %v1397_v60 }
  0x38   :  { %v940_v4 = vadd.f32 %v924_v46, %v904_v59  ;;  %v734_v5 = vadd.f32 %v718_v55, %v698_v62  ;;  %v775_v8 = vmul.f32 %v1405_v2, %v544_v35  ;;  %v889_v12 = vmul.f32 %v1374_v45, %v1318_v21 }
  0x39   :  { %v795_v11 = vmul.f32 %v1408_v3, %v1293_v9  ;;  %v925_v13 = vmul.f32 %v1335_v30, %v1402_v0  ;;  %v1422_v18 = vrot.slane %v1309_v16, %v829_v6  ;;  %v66_v20 = vadd.s32 24, %v1283_v1 }
  0x3a   :  { %v1099_v14 = vadd.f32 %v940_v4, %v755_v63  ;;  %v756_v17 = vadd.f32 %v1395_v58, %v734_v5  ;;  %v905_v24 = vadd.f32 %v889_v12, %v869_v7  ;;  %v482_v26 = vrot.slane %v1378_v47, 7 }
  0x3b   :  { %v811_v22 = vadd.f32 %v795_v11, %v775_v8  ;;  %v580_v27 = vrot.slane %v1424_v19, 1  ;;  %v831_v31 = vmul.f32 %v1422_v18, %v641_v39  ;;  %v104_v32 = vand.u32 7, %v66_v20 }
  0x3c   :  { %1115 = vst [vmem:[#allocation7] sm:$0xff] %v1099_v14  ;;  %v663_v35 = vmul.f32 %v1330_v28, %v1397_v60  ;;  %v683_v16 = vmul.f32 %v1333_v29, %v1318_v21  ;;  %v941_v37 = vadd.f32 %v925_v13, %v905_v24  ;;  %v508_v38 = vsel %vm495_vm0, %v481_v50, %v482_v26 }
  0x3d   :  { %v604_v41 = vsel %vm592_vm1, %v579_v51, %v580_v27  ;;  %v719_v42 = vmul.f32 %v1344_v33, %v1402_v0  ;;  %v847_v43 = vadd.f32 %v831_v31, %v811_v22  ;;  %vm466_vm8 = vcmp.gt.s32.totalorder %v104_v32, 0 }
  0x3e   :  { %vm563_vm9 = vcmp.lt.s32.totalorder %v104_v32, 7  ;;  %v699_v39 = vadd.f32 %v683_v16, %v663_v35  ;;  %v1440_v44 = vsel %vm466_vm8, %v508_v38, 0.0  ;;  %v776_v48 = vmul.f32 %v1405_v2, %v1353_v36 }
  0x3f   :  { %v1442_v46 = vsel %vm563_vm9, %v604_v41, 0.0  ;;  %v796_v49 = vmul.f32 %v1408_v3, %v1295_v10  ;;  %v1020_v50 = vadd.f32 %v847_v43, %v756_v17  ;;  %v832_v51 = vmul.f32 %v1422_v18, %v1365_v40 }
  0x40   :  { %v735_v52 = vadd.f32 %v719_v42, %v699_v39  ;;  %v870_v53 = vmul.f32 %v1347_v34, %v1440_v44  ;;  %v890_v55 = vmul.f32 %v1374_v45, %v1378_v47  ;;  %v926_v56 = vmul.f32 %v1335_v30, %v1442_v46 }
  0x41   :  { %v812_v54 = vadd.f32 %v796_v49, %v776_v48  ;;  %v67_v36 = vadd.s32 32, %v1283_v1  ;;  %v1100_v10 = vadd.f32 %v1020_v50, %v941_v37  ;;  %v483_v61 = vrot.slane %v1424_v19, 7  ;;  %v1488_v37 = vld [vmem:[#allocation2 + $0x30] sm:$0xff] }
  0x42   :  { %v757_v59 = vadd.f32 %v1395_v58, %v735_v52  ;;  %v581_v40 = vrot.slane %v1456_v57, 1  ;;  %v906_v63 = vadd.f32 %v890_v55, %v870_v53  ;;  %v664_v5 = vmul.f32 %v1330_v28, %v1440_v44 }
  0x43   :  { %v848_v62 = vadd.f32 %v832_v51, %v812_v54  ;;  %v111_v4 = vand.u32 7, %v67_v36  ;;  %1116 = vst [vmem:[#allocation7 + $0x8] sm:$0xff] %v1100_v10  ;;  %v507_v6 = vsel %vm495_vm0, %v482_v26, %v483_v61  ;;  %v684_v8 = vmul.f32 %v1333_v29, %v1378_v47 }
  0x44   :  { %v603_v7 = vsel %vm592_vm1, %v580_v27, %v581_v40  ;;  %v720_v11 = vmul.f32 %v1344_v33, %v1442_v46  ;;  %v942_v12 = vadd.f32 %v926_v56, %v906_v63  ;;  %v777_v22 = vmul.f32 %v1405_v2, %v1397_v60 }
  0x45   :  { %v1021_v13 = vadd.f32 %v848_v62, %v757_v59  ;;  %vm467_vm10 = vcmp.gt.s32.totalorder %v111_v4, 0  ;;  %vm564_vm11 = vcmp.lt.s32.totalorder %v111_v4, 7  ;;  %v700_v20 = vadd.f32 %v684_v8, %v664_v5  ;;  %v1508_v59 = vld [vmem:[#allocation2 + $0x38] sm:$0xff] }
  0x46   :  { %v1472_v14 = vsel %vm467_vm10, %v507_v6, 0.0  ;;  %v1474_v17 = vsel %vm564_vm11, %v603_v7, 0.0  ;;  %v797_v26 = vmul.f32 %v1408_v3, %v1318_v21  ;;  %v833_v27 = vmul.f32 %v1422_v18, %v1402_v0 }
  0x47   :  { %v1101_v24 = vadd.f32 %v1021_v13, %v942_v12  ;;  %v871_v31 = vmul.f32 %v1347_v34, %v1472_v14  ;;  %v736_v32 = vadd.f32 %v720_v11, %v700_v20  ;;  %v891_v35 = vmul.f32 %v1374_v45, %v1424_v19 }
  0x48   :  { %v927_v16 = vmul.f32 %v1335_v30, %v1474_v17  ;;  %v68_v60 = vadd.s32 40, %v1283_v1  ;;  %v813_v38 = vadd.f32 %v797_v26, %v777_v22  ;;  %v484_v21 = vrot.slane %v1456_v57, 7 }
  0x49   :  { %1117 = vst [vmem:[#allocation7 + $0x10] sm:$0xff] %v1101_v24  ;;  %v582_v0 = vrot.slane %v1488_v37, 1  ;;  %v665_v41 = vmul.f32 %v1330_v28, %v1472_v14  ;;  %v758_v42 = vadd.f32 %v1395_v58, %v736_v32  ;;  %v907_v43 = vadd.f32 %v891_v35, %v871_v31 }
  0x4a   :  { %v118_v39 = vand.u32 7, %v68_v60  ;;  %v685_v48 = vmul.f32 %v1333_v29, %v1424_v19  ;;  %v849_v49 = vadd.f32 %v833_v27, %v813_v38  ;;  %v506_v50 = vsel %vm495_vm0, %v483_v61, %v484_v21 }
  0x4b   :  { %v602_v52 = vsel %vm592_vm1, %v581_v40, %v582_v0  ;;  %v721_v51 = vmul.f32 %v1344_v33, %v1474_v17  ;;  %v943_v53 = vadd.f32 %v927_v16, %v907_v43  ;;  %v778_v10 = vmul.f32 %v1405_v2, %v1440_v44 }
  0x4c   :  { %vm468_vm12 = vcmp.gt.s32.totalorder %v118_v39, 0  ;;  %vm565_vm13 = vcmp.lt.s32.totalorder %v118_v39, 7  ;;  %v701_v54 = vadd.f32 %v685_v48, %v665_v41  ;;  %v1022_v55 = vadd.f32 %v849_v49, %v758_v42  ;;  %v1542_v49 = vld [vmem:[#allocation2 + $0x40] sm:$0xff] }
  0x4d   :  { %v549_v56 = vsel %vm468_vm12, %v506_v50, 0.0  ;;  %v1504_v36 = vsel %vm565_vm13, %v602_v52, 0.0  ;;  %v798_v40 = vmul.f32 %v1408_v3, %v1378_v47  ;;  %v834_v62 = vmul.f32 %v1422_v18, %v1442_v46 }
  0x4e   :  { %v737_v61 = vadd.f32 %v721_v51, %v701_v54  ;;  %v872_v63 = vmul.f32 %v1347_v34, %v549_v56  ;;  %v1102_v4 = vadd.f32 %v1022_v55, %v943_v53  ;;  %v892_v5 = vmul.f32 %v1374_v45, %v1456_v57 }
  0x4f   :  { %v928_v6 = vmul.f32 %v1335_v30, %v1504_v36  ;;  %v69_v44 = vadd.s32 48, %v1283_v1  ;;  %v814_v8 = vadd.f32 %v798_v40, %v778_v10  ;;  %v485_v11 = vrot.slane %v1488_v37, 7 }
  0x50   :  { %v759_v7 = vadd.f32 %v1395_v58, %v737_v61  ;;  %v583_v47 = vrot.slane %v1508_v59, 1  ;;  %1118 = vst [vmem:[#allocation7 + $0x18] sm:$0xff] %v1102_v4  ;;  %v908_v46 = vadd.f32 %v892_v5, %v872_v63  ;;  %v666_v13 = vmul.f32 %v1330_v28, %v549_v56 }
  0x51   :  { %v125_v12 = vand.u32 7, %v69_v44  ;;  %v686_v20 = vmul.f32 %v1333_v29, %v1456_v57  ;;  %v850_v22 = vadd.f32 %v834_v62, %v814_v8  ;;  %v505_v24 = vsel %vm495_vm0, %v484_v21, %v485_v11 }
  0x52   :  { %v601_v26 = vsel %vm592_vm1, %v582_v0, %v583_v47  ;;  %v722_v27 = vmul.f32 %v1344_v33, %v1504_v36  ;;  %v944_v31 = vadd.f32 %v928_v6, %v908_v46  ;;  %v779_v38 = vmul.f32 %v1405_v2, %v1472_v14 }
  0x53   :  { %vm469_vm14 = vcmp.gt.s32.totalorder %v125_v12, 0  ;;  %vm566_vm15 = vcmp.lt.s32.totalorder %v125_v12, 7  ;;  %v702_v32 = vadd.f32 %v686_v20, %v666_v13  ;;  %v1023_v35 = vadd.f32 %v850_v22, %v759_v7 }
  0x54   :  { %v550_v16 = vsel %vm469_vm14, %v505_v24, 0.0  ;;  %v647_v60 = vsel %vm566_vm15, %v601_v26, 0.0  ;;  %v799_v21 = vmul.f32 %v1408_v3, %v1424_v19  ;;  %v835_v0 = vmul.f32 %v1422_v18, %v1474_v17 }
  0x55   :  { %v738_v41 = vadd.f32 %v722_v27, %v702_v32  ;;  %v873_v42 = vmul.f32 %v1347_v34, %v550_v16  ;;  %v1103_v43 = vadd.f32 %v1023_v35, %v944_v31  ;;  %v893_v39 = vmul.f32 %v1374_v45, %v1488_v37  ;;  %v1572_v27 = vld [vmem:[#allocation2 + $0x48] sm:$0xff] }
  0x56   :  { %v929_v48 = vmul.f32 %v1335_v30, %v647_v60  ;;  %v70_v50 = vadd.s32 56, %v1283_v1  ;;  %v815_v52 = vadd.f32 %v799_v21, %v779_v38  ;;  %v486_v19 = vrot.slane %v1508_v59, 7 }
  0x57   :  { %v760_v14 = vadd.f32 %v1395_v58, %v738_v41  ;;  %v584_v51 = vrot.slane %v1542_v49, 1  ;;  %1119 = vst [vmem:[#allocation7 + $0x20] sm:$0xff] %v1103_v43  ;;  %v909_v17 = vadd.f32 %v893_v39, %v873_v42  ;;  %v667_v54 = vmul.f32 %v1330_v28, %v550_v16 }
  0x58   :  { %v132_v53 = vand.u32 7, %v70_v50  ;;  %v687_v55 = vmul.f32 %v1333_v29, %v1488_v37  ;;  %v851_v10 = vadd.f32 %v835_v0, %v815_v52  ;;  %v504_v61 = vsel %vm495_vm0, %v485_v11, %v486_v19 }
  0x59   :  { %v600_v40 = vsel %vm592_vm1, %v583_v47, %v584_v51  ;;  %v723_v62 = vmul.f32 %v1344_v33, %v647_v60  ;;  %v945_v63 = vadd.f32 %v929_v48, %v909_v17  ;;  %v780_v7 = vmul.f32 %v1405_v2, %v549_v56 }
  0x5a   :  { %vm470_vm2 = vcmp.gt.s32.totalorder %v132_v53, 0  ;;  %vm567_vm3 = vcmp.lt.s32.totalorder %v132_v53, 7  ;;  %v703_v4 = vadd.f32 %v687_v55, %v667_v54  ;;  %v1024_v5 = vadd.f32 %v851_v10, %v760_v14  ;;  %v1588_v55 = vld [vmem:[#allocation2 + $0x50] sm:$0xff] }
  0x5b   :  { %v551_v6 = vsel %vm470_vm2, %v504_v61, 0.0  ;;  %v648_v44 = vsel %vm567_vm3, %v600_v40, 0.0  ;;  %v800_v11 = vmul.f32 %v1408_v3, %v1456_v57  ;;  %v836_v46 = vmul.f32 %v1422_v18, %v1504_v36 }
  0x5c   :  { %v739_v8 = vadd.f32 %v723_v62, %v703_v4  ;;  %v874_v47 = vmul.f32 %v1347_v34, %v551_v6  ;;  %v1104_v12 = vadd.f32 %v1024_v5, %v945_v63  ;;  %v894_v13 = vmul.f32 %v1374_v45, %v1508_v59 }
  0x5d   :  { %v930_v20 = vmul.f32 %v1335_v30, %v648_v44  ;;  %v668_v22 = vmul.f32 %v1330_v28, %v551_v6  ;;  %v816_v56 = vadd.f32 %v800_v11, %v780_v7  ;;  %v688_v26 = vmul.f32 %v1333_v29, %v1508_v59 }
  0x5e   :  { %v761_v24 = vadd.f32 %v1395_v58, %v739_v8  ;;  %v724_v57 = vmul.f32 %v1344_v33, %v648_v44  ;;  %1120 = vst [vmem:[#allocation7 + $0x28] sm:$0xff] %v1104_v12  ;;  %v910_v36 = vadd.f32 %v894_v13, %v874_v47  ;;  %v781_v31 = vmul.f32 %v1405_v2, %v550_v16 }
  0x5f   :  { %v801_v32 = vmul.f32 %v1408_v3, %v1488_v37  ;;  %v837_v35 = vmul.f32 %v1422_v18, %v647_v60  ;;  %v852_v38 = vadd.f32 %v836_v46, %v816_v56  ;;  %v704_v41 = vadd.f32 %v688_v26, %v668_v22  ;;  %v1611_v46 = vld [vmem:[#allocation2 + $0x58] sm:$0xff] }
  0x60   :  { %v71_v21 = vadd.s32 64, %v1283_v1  ;;  %v72_v0 = vadd.s32 72, %v1283_v1  ;;  %v946_v59 = vadd.f32 %v930_v20, %v910_v36  ;;  %v487_v43 = vrot.slane %v1542_v49, 7 }
  0x61   :  { %v817_v42 = vadd.f32 %v801_v32, %v781_v31  ;;  %v488_v39 = vrot.slane %v1572_v27, 7  ;;  %v1025_v48 = vadd.f32 %v852_v38, %v761_v24  ;;  %v740_v50 = vadd.f32 %v724_v57, %v704_v41 }
  0x62   :  { %v139_v16 = vand.u32 7, %v71_v21  ;;  %v146_v14 = vand.u32 7, %v72_v0  ;;  %v503_v60 = vsel %vm495_vm0, %v486_v19, %v487_v43  ;;  %v585_v17 = vrot.slane %v1572_v27, 1 }
  0x63   :  { %v853_v52 = vadd.f32 %v837_v35, %v817_v42  ;;  %v502_v37 = vsel %vm495_vm0, %v487_v43, %v488_v39  ;;  %v1105_v53 = vadd.f32 %v1025_v48, %v946_v59  ;;  %v762_v54 = vadd.f32 %v1395_v58, %v740_v50 }
  0x64   :  { %vm471_vm4 = vcmp.gt.s32.totalorder %v139_v16, 0  ;;  %vm472_vm5 = vcmp.gt.s32.totalorder %v146_v14, 0  ;;  %vm568_vm6 = vcmp.lt.s32.totalorder %v139_v16, 7  ;;  %vm1592_vm7 = vcmp.lt.s32.totalorder %v146_v14, 7 }
  0x65   :  { %v552_v10 = vsel %vm471_vm4, %v503_v60, 0.0  ;;  %v1590_v61 = vsel %vm472_vm5, %v502_v37, 0.0  ;;  %1121 = vst [vmem:[#allocation7 + $0x30] sm:$0xff] %v1105_v53  ;;  %v1026_v62 = vadd.f32 %v853_v52, %v762_v54  ;;  %v586_v19 = vrot.slane %v1588_v55, 1  ;;  %v1640_v37 = vld [vmem:[#allocation2 + $0x60] sm:$0xff] }
  0x66   :  { %v599_v63 = vsel %vm592_vm1, %v584_v51, %v585_v17  ;;  %v669_v4 = vmul.f32 %v1330_v28, %v552_v10  ;;  %v689_v6 = vmul.f32 %v1333_v29, %v1542_v49  ;;  %v876_v44 = vmul.f32 %v1347_v34, %v1590_v61 }
  0x67   :  { %v649_v5 = vsel %vm568_vm6, %v599_v63, 0.0  ;;  %v896_v7 = vmul.f32 %v1374_v45, %v1572_v27  ;;  %1122 = vst [vmem:[#allocation7 + $0x38] sm:$0xff] %v1026_v62  ;;  %v598_v8 = vsel %vm592_vm1, %v585_v17, %v586_v19  ;;  %v73_v51 = vadd.s32 80, %v1283_v1 }
  0x68   :  { %v725_v11 = vmul.f32 %v1344_v33, %v649_v5  ;;  %v489_v47 = vrot.slane %v1588_v55, 7  ;;  %v650_v12 = vsel %vm1592_vm7, %v598_v8, 0.0  ;;  %v705_v13 = vadd.f32 %v689_v6, %v669_v4 }
  0x69   :  { %v912_v20 = vadd.f32 %v896_v7, %v876_v44  ;;  %v587_v22 = vrot.slane %v1611_v46, 1  ;;  %v932_v24 = vmul.f32 %v1335_v30, %v650_v12  ;;  %v153_v56 = vand.u32 7, %v73_v51 }
  0x6a   :  { %v501_v26 = vsel %vm495_vm0, %v488_v39, %v489_v47  ;;  %v670_v57 = vmul.f32 %v1330_v28, %v1590_v61  ;;  %v741_v36 = vadd.f32 %v725_v11, %v705_v13  ;;  %v690_v32 = vmul.f32 %v1333_v29, %v1572_v27 }
  0x6b   :  { %v597_v31 = vsel %vm592_vm1, %v586_v19, %v587_v22  ;;  %v726_v35 = vmul.f32 %v1344_v33, %v650_v12  ;;  %v948_v38 = vadd.f32 %v932_v24, %v912_v20  ;;  %vm473_vm8 = vcmp.gt.s32.totalorder %v153_v56, 0 }
  0x6c   :  { %vm570_vm9 = vcmp.lt.s32.totalorder %v153_v56, 7  ;;  %v783_v41 = vmul.f32 %v1405_v2, %v552_v10  ;;  %v763_v21 = vadd.f32 %v1395_v58, %v741_v36  ;;  %v554_v0 = vsel %vm473_vm8, %v501_v26, 0.0  ;;  %v1667_v36 = vld [vmem:[#allocation2 + $0x68] sm:$0xff] }
  0x6d   :  { %v1630_v59 = vsel %vm570_vm9, %v597_v31, 0.0  ;;  %v706_v42 = vadd.f32 %v690_v32, %v670_v57  ;;  %v803_v43 = vmul.f32 %v1408_v3, %v1542_v49  ;;  %v839_v39 = vmul.f32 %v1422_v18, %v649_v5 }
  0x6e   :  { %v877_v48 = vmul.f32 %v1347_v34, %v554_v0  ;;  %v897_v50 = vmul.f32 %v1374_v45, %v1588_v55  ;;  %v1107_v16 = vadd.f32 %v948_v38, %v763_v21  ;;  %v933_v52 = vmul.f32 %v1335_v30, %v1630_v59 }
  0x6f   :  { %v742_v14 = vadd.f32 %v726_v35, %v706_v42  ;;  %v74_v60 = vadd.s32 88, %v1283_v1  ;;  %v819_v17 = vadd.f32 %v803_v43, %v783_v41  ;;  %v490_v49 = vrot.slane %v1611_v46, 7 }
  0x70   :  { %v913_v53 = vadd.f32 %v897_v50, %v877_v48  ;;  %v588_v54 = vrot.slane %v1640_v37, 1  ;;  %1123 = vst [vmem:[#allocation7 + $0x40] sm:$0xff] %v1107_v16  ;;  %v671_v62 = vmul.f32 %v1330_v28, %v554_v0  ;;  %v691_v19 = vmul.f32 %v1333_v29, %v1588_v55 }
  0x71   :  { %v764_v10 = vadd.f32 %v1395_v58, %v742_v14  ;;  %v160_v40 = vand.u32 7, %v74_v60  ;;  %v855_v63 = vadd.f32 %v839_v39, %v819_v17  ;;  %v500_v5 = vsel %vm495_vm0, %v489_v47, %v490_v49 }
  0x72   :  { %v949_v4 = vadd.f32 %v933_v52, %v913_v53  ;;  %v596_v6 = vsel %vm592_vm1, %v587_v22, %v588_v54  ;;  %v707_v44 = vadd.f32 %v691_v19, %v671_v62  ;;  %v727_v7 = vmul.f32 %v1344_v33, %v1630_v59 }
  0x73   :  { %vm474_vm10 = vcmp.gt.s32.totalorder %v160_v40, 0  ;;  %vm571_vm11 = vcmp.lt.s32.totalorder %v160_v40, 7  ;;  %v1028_v8 = vadd.f32 %v855_v63, %v764_v10  ;;  %v784_v13 = vmul.f32 %v1405_v2, %v1590_v61  ;;  %v1694_v63 = vld [vmem:[#allocation2 + $0x70] sm:$0xff] }
  0x74   :  { %v555_v11 = vsel %vm474_vm10, %v500_v5, 0.0  ;;  %v1655_v51 = vsel %vm571_vm11, %v596_v6, 0.0  ;;  %v743_v20 = vadd.f32 %v727_v7, %v707_v44  ;;  %v804_v47 = vmul.f32 %v1408_v3, %v1572_v27 }
  0x75   :  { %v840_v24 = vmul.f32 %v1422_v18, %v650_v12  ;;  %v878_v22 = vmul.f32 %v1347_v34, %v555_v11  ;;  %v1108_v56 = vadd.f32 %v1028_v8, %v949_v4  ;;  %v898_v26 = vmul.f32 %v1374_v45, %v1611_v46 }
  0x76   :  { %v934_v57 = vmul.f32 %v1335_v30, %v1655_v51  ;;  %v75_v31 = vadd.s32 96, %v1283_v1  ;;  %v765_v61 = vadd.f32 %v1395_v58, %v743_v20  ;;  %v820_v32 = vadd.f32 %v804_v47, %v784_v13 }
  0x77   :  { %v491_v27 = vrot.slane %v1640_v37, 7  ;;  %v589_v12 = vrot.slane %v1667_v36, 1  ;;  %1124 = vst [vmem:[#allocation7 + $0x48] sm:$0xff] %v1108_v56  ;;  %v914_v35 = vadd.f32 %v898_v26, %v878_v22  ;;  %v672_v41 = vmul.f32 %v1330_v28, %v555_v11 }
  0x78   :  { %v167_v38 = vand.u32 7, %v75_v31  ;;  %v692_v21 = vmul.f32 %v1333_v29, %v1611_v46  ;;  %v856_v42 = vadd.f32 %v840_v24, %v820_v32  ;;  %v728_v48 = vmul.f32 %v1344_v33, %v1655_v51 }
  0x79   :  { %v499_v43 = vsel %vm495_vm0, %v490_v49, %v491_v27  ;;  %v595_v39 = vsel %vm592_vm1, %v588_v54, %v589_v12  ;;  %v950_v50 = vadd.f32 %v934_v57, %v914_v35  ;;  %v785_v17 = vmul.f32 %v1405_v2, %v554_v0 }
  0x7a   :  { %vm475_vm12 = vcmp.gt.s32.totalorder %v167_v38, 0  ;;  %vm572_vm13 = vcmp.lt.s32.totalorder %v167_v38, 7  ;;  %v708_v16 = vadd.f32 %v692_v21, %v672_v41  ;;  %v1029_v14 = vadd.f32 %v856_v42, %v765_v61 }
  0x7b   :  { %v556_v52 = vsel %vm475_vm12, %v499_v43, 0.0  ;;  %v1682_v60 = vsel %vm572_vm13, %v595_v39, 0.0  ;;  %v805_v49 = vmul.f32 %v1408_v3, %v1588_v55  ;;  %v841_v54 = vmul.f32 %v1422_v18, %v1630_v59 }
  0x7c   :  { %v744_v53 = vadd.f32 %v728_v48, %v708_v16  ;;  %v879_v10 = vmul.f32 %v1347_v34, %v556_v52  ;;  %v1109_v40 = vadd.f32 %v1029_v14, %v950_v50  ;;  %v899_v62 = vmul.f32 %v1374_v45, %v1640_v37 }
  0x7d   :  { %v935_v19 = vmul.f32 %v1335_v30, %v1682_v60  ;;  %v76_v0 = vadd.s32 104, %v1283_v1  ;;  %v821_v5 = vadd.f32 %v805_v49, %v785_v17  ;;  %v492_v55 = vrot.slane %v1667_v36, 7 }
  0x7e   :  { %v766_v4 = vadd.f32 %v1395_v58, %v744_v53  ;;  %v590_v59 = vrot.slane %v1694_v63, 1  ;;  %1125 = vst [vmem:[#allocation7 + $0x50] sm:$0xff] %v1109_v40  ;;  %v915_v6 = vadd.f32 %v899_v62, %v879_v10  ;;  %v673_v7 = vmul.f32 %v1330_v28, %v556_v52 }
  0x7f   :  { %v174_v44 = vand.u32 7, %v76_v0  ;;  %v693_v8 = vmul.f32 %v1333_v29, %v1640_v37  ;;  %v857_v13 = vadd.f32 %v841_v54, %v821_v5  ;;  %v498_v20 = vsel %vm495_vm0, %v491_v27, %v492_v55 }
  0x80   :  { %v594_v47 = vsel %vm592_vm1, %v589_v12, %v590_v59  ;;  %v729_v24 = vmul.f32 %v1344_v33, %v1682_v60  ;;  %v951_v22 = vadd.f32 %v935_v19, %v915_v6  ;;  %v786_v61 = vmul.f32 %v1405_v2, %v555_v11 }
  0x81   :  { %vm476_vm14 = vcmp.gt.s32.totalorder %v174_v44, 0  ;;  %vm573_vm15 = vcmp.lt.s32.totalorder %v174_v44, 7  ;;  %v709_v56 = vadd.f32 %v693_v8, %v673_v7  ;;  %v1030_v26 = vadd.f32 %v857_v13, %v766_v4 }
  0x82   :  { %v557_v57 = vsel %vm476_vm14, %v498_v20, 0.0  ;;  %v654_v31 = vsel %vm573_vm15, %v594_v47, 0.0  ;;  %v806_v35 = vmul.f32 %v1408_v3, %v1611_v46  ;;  %v842_v27 = vmul.f32 %v1422_v18, %v1655_v51 }
  0x83   :  { %v745_v32 = vadd.f32 %v729_v24, %v709_v56  ;;  %v880_v12 = vmul.f32 %v1347_v34, %v557_v57  ;;  %v1110_v38 = vadd.f32 %v1030_v26, %v951_v22  ;;  %v900_v41 = vmul.f32 %v1374_v45, %v1667_v36 }
  0x84   :  { %v936_v21 = vmul.f32 %v1335_v30, %v654_v31  ;;  %v77_v42 = vadd.s32 112, %v1283_v1  ;;  %v822_v11 = vadd.f32 %v806_v35, %v786_v61  ;;  %v493_v39 = vrot.slane %v1694_v63, 7 }
  0x85   :  { %v767_v43 = vadd.f32 %v1395_v58, %v745_v32  ;;  %v591_v46 = vrot.slane %v1307_v15, 1  ;;  %1126 = vst [vmem:[#allocation7 + $0x58] sm:$0xff] %v1110_v38  ;;  %v916_v48 = vadd.f32 %v900_v41, %v880_v12  ;;  %v674_v50 = vmul.f32 %v1330_v28, %v557_v57 }
  0x86   :  { %v181_v51 = vand.u32 7, %v77_v42  ;;  %v694_v16 = vmul.f32 %v1333_v29, %v1667_v36  ;;  %v858_v14 = vadd.f32 %v842_v27, %v822_v11  ;;  %v497_v17 = vsel %vm495_vm0, %v492_v55, %v493_v39 }
  0x87   :  { %v593_v53 = vsel %vm592_vm1, %v590_v59, %v591_v46  ;;  %v730_v49 = vmul.f32 %v1344_v33, %v654_v31  ;;  %v952_v54 = vadd.f32 %v936_v21, %v916_v48  ;;  %v787_v0 = vmul.f32 %v1405_v2, %v556_v52 }
  0x88   :  { %vm477_vm2 = vcmp.gt.s32.totalorder %v181_v51, 0  ;;  %vm574_vm3 = vcmp.lt.s32.totalorder %v181_v51, 7  ;;  %v710_v10 = vadd.f32 %v694_v16, %v674_v50  ;;  %v1031_v40 = vadd.f32 %v858_v14, %v767_v43 }
  0x89   :  { %v558_v62 = vsel %vm477_vm2, %v497_v17, 0.0  ;;  %v655_v19 = vsel %vm574_vm3, %v593_v53, 0.0  ;;  %v807_v5 = vmul.f32 %v1408_v3, %v1640_v37  ;;  %v843_v55 = vmul.f32 %v1422_v18, %v1682_v60 }
  0x8a   :  { %v746_v4 = vadd.f32 %v730_v49, %v710_v10  ;;  %v881_v59 = vmul.f32 %v1347_v34, %v558_v62  ;;  %v1111_v6 = vadd.f32 %v1031_v40, %v952_v54  ;;  %v901_v44 = vmul.f32 %v1374_v45, %v1694_v63 }
  0x8b   :  { %v937_v7 = vmul.f32 %v1335_v30, %v655_v19  ;;  %v78_v8 = vadd.s32 120, %v1283_v1  ;;  %v823_v52 = vadd.f32 %v807_v5, %v787_v0  ;;  %v496_v37 = vsel %vm495_vm0, %v493_v39, %v494_v23 }
  0x8c   :  { %v768_v13 = vadd.f32 %v1395_v58, %v746_v4  ;;  %v608_v60 = vsel %vm592_vm1, %v591_v46, %v576_v25  ;;  %1127 = vst [vmem:[#allocation7 + $0x60] sm:$0xff] %v1111_v6  ;;  %v917_v20 = vadd.f32 %v901_v44, %v881_v59  ;;  %v675_v24 = vmul.f32 %v1330_v28, %v558_v62 }
  0x8d   :  { %v188_v47 = vand.u32 7, %v78_v8  ;;  %v695_v22 = vmul.f32 %v1333_v29, %v1694_v63  ;;  %v859_v56 = vadd.f32 %v843_v55, %v823_v52  ;;  %v731_v26 = vmul.f32 %v1344_v33, %v655_v19 }
  0x8e   :  { %v788_v61 = vmul.f32 %v1405_v2, %v557_v57  ;;  %v808_v23 = vmul.f32 %v1408_v3, %v1667_v36  ;;  %v953_v9 = vadd.f32 %v937_v7, %v917_v20  ;;  %v844_v38 = vmul.f32 %v1422_v18, %v654_v31 }
  0x8f   :  { %vm478_vm0 = vcmp.gt.s32.totalorder %v188_v47, 0  ;;  %vm575_vm4 = vcmp.lt.s32.totalorder %v188_v47, 7  ;;  %v711_v1 = vadd.f32 %v695_v22, %v675_v24  ;;  %v1032_v25 = vadd.f32 %v859_v56, %v768_v13 }
  0x90   :  { %v559_v32 = vsel %vm478_vm0, %v496_v37, 0.0  ;;  %v656_v35 = vsel %vm575_vm4, %v608_v60, 0.0  ;;  %v824_v27 = vadd.f32 %v808_v23, %v788_v61  ;;  %v902_v21 = vmul.f32 %v1374_v45, %v1307_v15 }
  0x91   :  { %v747_v12 = vadd.f32 %v731_v26, %v711_v1  ;;  %v882_v41 = vmul.f32 %v1347_v34, %v559_v32  ;;  %v1112_v57 = vadd.f32 %v1032_v25, %v953_v9  ;;  %v938_v42 = vmul.f32 %v1335_v30, %v656_v35 }
  0x92   :  { %v676_v36 = vmul.f32 %v1330_v28, %v559_v32  ;;  %v696_v43 = vmul.f32 %v1333_v29, %v1307_v15  ;;  %v860_v39 = vadd.f32 %v844_v38, %v824_v27  ;;  %v732_v48 = vmul.f32 %v1344_v33, %v656_v35 }
  0x93   :  { %v769_v11 = vadd.f32 %v1395_v58, %v747_v12  ;;  %v918_v46 = vadd.f32 %v902_v21, %v882_v41  ;;  %1128 = vst [vmem:[#allocation7 + $0x68] sm:$0xff] %v1112_v57  ;;  %v789_v34 = vmul.f32 %v1405_v2, %v558_v62  ;;  %v809_v45 = vmul.f32 %v1408_v3, %v1694_v63 }
  0x94   :  { %v712_v31 = vadd.f32 %v696_v43, %v676_v36  ;;  %v845_v30 = vmul.f32 %v1422_v18, %v655_v19 }
  0x95   :  { %v954_v51 = vadd.f32 %v938_v42, %v918_v46  ;;  %v1033_v28 = vadd.f32 %v860_v39, %v769_v11  ;;  %v825_v16 = vadd.f32 %v809_v45, %v789_v34 }
  0x96   :  { %v748_v50 = vadd.f32 %v732_v48, %v712_v31 }
  0x97   :  { %v1113_v15 = vadd.f32 %v1033_v28, %v954_v51  ;;  %v861_v14 = vadd.f32 %v845_v30, %v825_v16 }
  0x98   :  { %v770_v29 = vadd.f32 %v1395_v58, %v748_v50 }
  0x99   :  { %1129 = vst [vmem:[#allocation7 + $0x70] sm:$0xff] %v1113_v15 }
  0x9a   :  { %v1034_v33 = vadd.f32 %v861_v14, %v770_v29 }
  0x9c   :  { %1130 = vst [vmem:[#allocation7 + $0x78] sm:$0xff] %v1034_v33 }
  0x9d   :  { %1211 = shalt.err (!%p1208_p6)
}
  0x9e   :  { %s1212_s15 = scalar_lea.hbm %s1789_s3, 2048 }
  0x9f   :  { %p1213_p7 = scmp.ne.s32.totalorder %s1789_s3, %s1212_s15  ;;  %p1216_p8 = scmp.lt.u32.totalorder %s1212_s15, %s1789_s3 }
  0xa1   :  { %p1218_p9 = pnand %p1216_p8, %p1213_p7 }
  0xa3   :  { %1221 = shalt.err (!%p1218_p9)
}
  0xa4   :  { %1142 = dma.vmem_to_hbm [thread:$0]  %s1137_s11, 2048, %s1789_s3, [#allocation4], %s1229_s22, %s1229_s22, %s1230_s23  }
  0xa5   :  { %1226 = dma.done.wait [#allocation4], 2048  }
  0xa6   :  { %1227 = vsyncadd [#allocation4], 4294965248 }
  0xa7   :  { %1146 = vsyncpa [#allocation3], 1 }
  0xa8   :  { %1147 = vsyncpa [#allocation6], 1 }
  0xa9   :  { %1148 = vsyncpa [#allocation4], 1 }

</bundles_post_ra>
